<compile_context>
chip_gen: v6e
topology: v6e:2x2x1
jax: 0.10.0
libtpu: 0.0.40
codegen_flags: <defaults>
</compile_context>

<pallas_src>
import functools

import numpy as np
import jax
import jax.numpy as jnp
from jax import lax
from jax.experimental import pallas as pl
from jax.experimental.pallas import tpu as pltpu

BN_EPS = 1e-5
BN_SCALE = float(1.0 / np.sqrt(1.0 + BN_EPS))
HIDDEN_LAYERS = 32        # hidden width inside the message / update MLPs


def _vmem():
    return pl.BlockSpec(memory_space=pltpu.MemorySpace.VMEM)


def _smem():
    return pl.BlockSpec(memory_space=pltpu.MemorySpace.SMEM)


# ---------------------------------------------------------------- kernel ----

def fused_mpnn_kernel(x_ref, src_ref, dst_ref, batch_ref, eattr_ref, invcnt_ref,
                      win_ref, bin_ref,
                      wmsg1_ref, w1c_ref, b1_ref, w2_ref, b2_ref,
                      wupd1_ref, bu1_ref, wu2_ref, bu2_ref,
                      headw_ref, headb_ref,
                      out_ref,
                      pi_ref, pj_ref, m_ref, aggr_ref, pooled_ref):
    f32 = jnp.float32
    bf16 = jnp.bfloat16
    n = x_ref.shape[0]
    e = m_ref.shape[0]
    hl = HIDDEN_LAYERS
    num_layers = wmsg1_ref.shape[0]

    # lin_in: h0 = x @ W_in + b_in   (bf16 operands, f32 accumulation)
    h0 = (jnp.dot(x_ref[...].astype(bf16), win_ref[...], preferred_element_type=f32)
          + bin_ref[...])

    def layer_body(l, h):
        h16 = h.astype(bf16)

        # --- message MLP: project-then-gather ------------------------------
        # one lane-dense [64,64] matmul: p[:, :hl] = h @ w1a, p[:, hl:] = h @ w1b
        p = jnp.dot(h16, wmsg1_ref[l], preferred_element_type=f32)      # [N, 2*hl]
        pi_ref[...] = p[:, :hl]
        pj_ref[...] = p[:, hl:]
        w1c = w1c_ref[l]                      # [1, hl]  rank-1 edge term (edge_dim==1)
        b1 = b1_ref[l]                        # [1, hl]

        def gather_body(k, c):                # true index-based gather (SMEM indices)
            d = dst_ref[k]
            s = src_ref[k]
            ev = eattr_ref[k]
            row = (pi_ref[pl.ds(d, 1), :] + pj_ref[pl.ds(s, 1), :]
                   + ev * w1c + b1)
            m_ref[pl.ds(k, 1), 0:hl] = row
            return c
        lax.fori_loop(0, e, gather_body, 0)

        g = jnp.maximum(m_ref[:, 0:hl], 0.0)                            # [E, hl]
        m = jnp.dot(g.astype(bf16), w2_ref[l], preferred_element_type=f32) + b2_ref[l]
        m_ref[...] = jnp.maximum(m, 0.0)      # post-ReLU BN folded into w2/b2

        # --- aggregate: true scatter-add into an [N, H] VMEM accumulator ---
        aggr_ref[...] = jnp.zeros_like(aggr_ref)

        def scatter_body(k, c):
            d = dst_ref[k]
            aggr_ref[pl.ds(d, 1), :] = aggr_ref[pl.ds(d, 1), :] + m_ref[pl.ds(k, 1), :]
            return c
        lax.fori_loop(0, e, scatter_body, 0)

        # --- update MLP: fused K=128 first layer ---------------------------
        ua = jnp.concatenate([h, aggr_ref[...]], axis=1).astype(bf16)   # [N, 128]
        u = jnp.dot(ua, wupd1_ref[l], preferred_element_type=f32) + bu1_ref[l]
        u = jnp.maximum(u, 0.0)
        u = jnp.dot(u.astype(bf16), wu2_ref[l], preferred_element_type=f32) + bu2_ref[l]
        u = jnp.maximum(u, 0.0)               # post-ReLU BN folded into wu2/bu2
        return h + u                          # x += conv(x, edge_index, edge_attr)

    h = lax.fori_loop(0, num_layers, layer_body, h0)

    # --- global_mean_pool (true scatter over nodes) + Linear(H,1) + ReLU ---
    aggr_ref[...] = h                         # reuse the accumulator as h staging
    pooled_ref[...] = jnp.zeros_like(pooled_ref)

    def pool_body(k, c):
        b = batch_ref[k]
        pooled_ref[pl.ds(b, 1), :] = pooled_ref[pl.ds(b, 1), :] + aggr_ref[pl.ds(k, 1), :]
        return c
    lax.fori_loop(0, n, pool_body, 0)

    pooled = pooled_ref[...] * invcnt_ref[...]                          # mean pool
    y = jnp.dot(pooled, headw_ref[...], preferred_element_type=f32) + headb_ref[...]
    out_ref[...] = jnp.maximum(y, 0.0)        # lane-1 store; negligible at small B


# ---------------------------------------------------------------- wrapper ---

@functools.partial(jax.jit, static_argnames=("num_graphs",))
def mpnn_forward(packed, x, src, dst, edge_attr, batch, *, num_graphs):
    n, in_dim = x.shape
    e = src.shape[0]
    hidden = packed["win"].shape[1]
    hl = HIDDEN_LAYERS
    num_layers = packed["wmsg1"].shape[0]

    src = src.astype(jnp.int32)
    dst = dst.astype(jnp.int32)
    batch = batch.astype(jnp.int32)
    eattr = edge_attr.reshape(-1).astype(jnp.float32)     # edge_dim == 1
    # mean-pool counts depend only on batch (static input data): compute outside.
    counts = jnp.zeros((num_graphs, 1), jnp.float32).at[batch, 0].add(1.0)
    inv_counts = 1.0 / jnp.maximum(counts, 1.0)

    args = (x, src, dst, batch, eattr, inv_counts,
            packed["win"], packed["bin"],
            packed["wmsg1"], packed["w1c"], packed["b1"], packed["w2"], packed["b2"],
            packed["wupd1"], packed["bu1"], packed["wu2"], packed["bu2"],
            packed["headw"], packed["headb"])
    in_specs = ([_vmem(), _smem(), _smem(), _smem(), _smem(), _vmem()]
                + [_vmem()] * 13)

    flops = 2 * (n * in_dim * hidden
                 + num_layers * (n * hidden * 2 * hl      # fused message projection
                                 + e * hl * hidden        # message MLP layer 2
                                 + n * 2 * hidden * hl    # fused update layer 1
                                 + n * hl * hidden)       # update layer 2
                 + num_graphs * hidden)
    bytes_accessed = (x.size * 4 + e * 12 + n * 4 + num_graphs * 8
                      + sum(int(np.prod(packed[k].shape)) * packed[k].dtype.itemsize
                            for k in packed))

    out = pl.pallas_call(
        fused_mpnn_kernel,
        out_shape=jax.ShapeDtypeStruct((num_graphs, 1), jnp.float32),
        in_specs=in_specs,
        out_specs=_vmem(),
        scratch_shapes=[
            pltpu.VMEM((n, hl), jnp.float32),               # pi: dst-side projection
            pltpu.VMEM((n, hl), jnp.float32),               # pj: src-side projection
            pltpu.VMEM((e, hidden), jnp.float32),           # per-edge message staging
            pltpu.VMEM((n, hidden), jnp.float32),           # scatter-add accumulator
            pltpu.VMEM((num_graphs, hidden), jnp.float32),  # per-graph pool accumulator
        ],
        compiler_params=pltpu.CompilerParams(vmem_limit_bytes=48 * 1024 * 1024),
        cost_estimate=pl.CostEstimate(flops=int(flops), transcendentals=0,
                                      bytes_accessed=int(bytes_accessed)),
    )(*args)
    return out.reshape(-1)                                  # .view(-1)


# -------------------------------------------------------- param handling ----

def _linear_init(key, fan_in, fan_out):
    kw, kb = jax.random.split(key)
    bound = 1.0 / np.sqrt(fan_in)
    w = jax.random.uniform(kw, (fan_in, fan_out), jnp.float32, -bound, bound)
    b = jax.random.uniform(kb, (1, fan_out), jnp.float32, -bound, bound)
    return w, b


def init_params(key, in_dim, edge_dim, hidden_dim=64, hidden_layers=32, num_layers=3):
    keys = jax.random.split(key, 2 + num_layers)
    params = {}
    params["lin_in_w"], params["lin_in_b"] = _linear_init(keys[0], in_dim, hidden_dim)
    layers = []
    for l in range(num_layers):
        lk = jax.random.split(keys[2 + l], 4)
        w1, b1 = _linear_init(lk[0], 2 * hidden_dim + edge_dim, hidden_layers)
        w2, b2 = _linear_init(lk[1], hidden_layers, hidden_dim)
        wu1, bu1 = _linear_init(lk[2], 2 * hidden_dim, hidden_layers)
        wu2, bu2 = _linear_init(lk[3], hidden_layers, hidden_dim)
        # Eval-mode BatchNorm folding (running mean=0, var=1, affine=identity):
        #   * BN right after a Linear -> fold scale into that Linear  (w1/b1, wu1/bu1)
        #   * BN after the last ReLU  -> relu(z)*s == relu(z*s), s>0  (w2/b2, wu2/bu2)
        # With trained BN parameters these folds must be recomputed from the stats.
        layers.append(dict(
            w1a=w1[:hidden_dim] * BN_SCALE,
            w1b=w1[hidden_dim:2 * hidden_dim] * BN_SCALE,
            w1c=w1[2 * hidden_dim:] * BN_SCALE,
            b1=b1 * BN_SCALE,
            w2=w2 * BN_SCALE, b2=b2 * BN_SCALE,
            wu1a=wu1[:hidden_dim] * BN_SCALE,
            wu1b=wu1[hidden_dim:] * BN_SCALE,
            bu1=bu1 * BN_SCALE,
            wu2=wu2 * BN_SCALE, bu2=bu2 * BN_SCALE,
        ))
    params["layers"] = layers
    params["head_w"], params["head_b"] = _linear_init(keys[1], hidden_dim, 1)
    return params


def pack_params(params):
    """Stack per-layer weights along a leading layer axis, fuse the message / update
    first-layer slabs into lane-dense tiles, and pre-cast MXU operands to bf16."""
    bf16 = jnp.bfloat16
    ls = params["layers"]
    st = lambda k: jnp.stack([lp[k] for lp in ls], axis=0)
    return dict(
        win=params["lin_in_w"].astype(bf16), bin=params["lin_in_b"],
        # fused [w1a | w1b] -> [H, 2*HL] so one matmul yields both projections
        wmsg1=jnp.stack([jnp.concatenate([lp["w1a"], lp["w1b"]], axis=1)
                         for lp in ls]).astype(bf16),
        w1c=st("w1c"), b1=st("b1"),
        w2=st("w2").astype(bf16), b2=st("b2"),
        # fused [wu1a ; wu1b] -> [2H, HL] so [h | aggr] @ wu1 is one K=128 matmul
        wupd1=jnp.stack([jnp.concatenate([lp["wu1a"], lp["wu1b"]], axis=0)
                         for lp in ls]).astype(bf16),
        bu1=st("bu1"),
        wu2=st("wu2").astype(bf16), bu2=st("bu2"),
        headw=params["head_w"], headb=params["head_b"],
    )


def ref_forward(params, x, src, dst, edge_attr, batch, num_graphs):
    """Pure-JAX f32 reference of the same eval-mode forward pass."""
    h = x @ params["lin_in_w"] + params["lin_in_b"]
    for lp in params["layers"]:
        x_i = h[dst]
        x_j = h[src]
        g = jnp.maximum(x_i @ lp["w1a"] + x_j @ lp["w1b"]
                        + edge_attr @ lp["w1c"] + lp["b1"], 0.0)
        m = jnp.maximum(g @ lp["w2"] + lp["b2"], 0.0)
        aggr = jnp.zeros_like(h).at[dst].add(m)
        u = jnp.maximum(h @ lp["wu1a"] + aggr @ lp["wu1b"] + lp["bu1"], 0.0)
        u = jnp.maximum(u @ lp["wu2"] + lp["bu2"], 0.0)
        h = h + u
    summed = jnp.zeros((num_graphs, h.shape[1]), jnp.float32).at[batch].add(h)
    counts = jnp.zeros((num_graphs, 1), jnp.float32).at[batch].add(1.0)
    pooled = summed / jnp.maximum(counts, 1.0)
    return jnp.maximum(pooled @ params["head_w"] + params["head_b"], 0.0).reshape(-1)


# ------------------------------------------------------------------- main ---

if __name__ == "__main__":
    N, IN_DIM, EDGE_DIM, HIDDEN, K, NUM_GRAPHS = 32, 16, 1, 64, 5, 2
    E = N * K

    key = jax.random.PRNGKey(0)
    kx, ke, ks, kp = jax.random.split(key, 4)

    x = jax.random.normal(kx, (N, IN_DIM), jnp.float32)             # data.x
    dst = jnp.repeat(jnp.arange(N, dtype=jnp.int32), K)             # edge_index[1] (knn targets)
    src = jax.random.randint(ks, (E,), 0, N, jnp.int32)             # edge_index[0] (knn sources)
    edge_attr = jax.random.uniform(ke, (E, EDGE_DIM), jnp.float32)  # data.edge_deltaR
    batch = jnp.concatenate([jnp.zeros(N // 2, jnp.int32),
                             jnp.ones(N - N // 2, jnp.int32)])      # data.batch

    params = init_params(kp, IN_DIM, EDGE_DIM, hidden_dim=HIDDEN,
                         hidden_layers=HIDDEN_LAYERS, num_layers=3)
    packed = pack_params(params)

    out = jax.block_until_ready(
        mpnn_forward(packed, x, src, dst, edge_attr, batch, num_graphs=NUM_GRAPHS))
    ref = jax.block_until_ready(
        ref_forward(params, x, src, dst, edge_attr, batch, NUM_GRAPHS))

    # Kernel uses bf16 MXU operands (f32 accumulation) vs. the pure-f32 reference;
    # gather / scatter / pooling are now exact f32 index-based ops.
    np.testing.assert_allclose(np.asarray(out), np.asarray(ref), rtol=2e-2, atol=2e-2)

    assert out.shape == (NUM_GRAPHS,)
    print("KERNEL_OK")
</pallas_src>

<mosaic_0001>
module attributes {stable_mosaic.version = 11 : i64} {
  func.func private @main(%arg0: i32) attributes {dimension_semantics = [#tpu.dimension_semantics<core_parallel>], iteration_bounds = array<i64: 2>, tpu.core_type = #tpu.core_type<sc_scalar_subcore>, window_params = []} {
    return
  }
}

module attributes {stable_mosaic.version = 11 : i64} {
  func.func private @main(%arg0: i32) attributes {dimension_semantics = [#tpu.dimension_semantics<core_parallel>], iteration_bounds = array<i64: 2>, tpu.core_type = #tpu.core_type<sc_scalar_subcore>, window_params = []} {
    return
  }
}

module attributes {stable_mosaic.version = 11 : i64} {
  func.func @fused_mpnn_kernel(%arg0: memref<32x16xf32, #tpu.memory_space<vmem>>, %arg1: memref<160xi32, #tpu.memory_space<smem>>, %arg2: memref<160xi32, #tpu.memory_space<smem>>, %arg3: memref<32xi32, #tpu.memory_space<smem>>, %arg4: memref<160xf32, #tpu.memory_space<smem>>, %arg5: memref<2x1xf32, #tpu.memory_space<vmem>>, %arg6: memref<16x64xbf16, #tpu.memory_space<vmem>>, %arg7: memref<1x64xf32, #tpu.memory_space<vmem>>, %arg8: memref<3x64x64xbf16, #tpu.memory_space<vmem>>, %arg9: memref<3x1x32xf32, #tpu.memory_space<vmem>>, %arg10: memref<3x1x32xf32, #tpu.memory_space<vmem>>, %arg11: memref<3x32x64xbf16, #tpu.memory_space<vmem>>, %arg12: memref<3x1x64xf32, #tpu.memory_space<vmem>>, %arg13: memref<3x128x32xbf16, #tpu.memory_space<vmem>>, %arg14: memref<3x1x32xf32, #tpu.memory_space<vmem>>, %arg15: memref<3x32x64xbf16, #tpu.memory_space<vmem>>, %arg16: memref<3x1x64xf32, #tpu.memory_space<vmem>>, %arg17: memref<64x1xf32, #tpu.memory_space<vmem>>, %arg18: memref<1x1xf32, #tpu.memory_space<vmem>>, %arg19: memref<2x1xf32, #tpu.memory_space<vmem>>, %arg20: memref<32x32xf32, #tpu.memory_space<vmem>>, %arg21: memref<32x32xf32, #tpu.memory_space<vmem>>, %arg22: memref<160x64xf32, #tpu.memory_space<vmem>>, %arg23: memref<32x64xf32, #tpu.memory_space<vmem>>, %arg24: memref<2x64xf32, #tpu.memory_space<vmem>>) attributes {dimension_semantics = [], scalar_prefetch = 0 : i64, scratch_operands = 5 : i64, tpu.core_type = #tpu.core_type<tc>} {
    %c0 = arith.constant 0 : index
    %c0_0 = arith.constant 0 : index
    %0 = vector.load %arg0[%c0, %c0_0] : memref<32x16xf32, #tpu.memory_space<vmem>>, vector<32x16xf32>
    %1 = arith.truncf %0 : vector<32x16xf32> to vector<32x16xbf16>
    %c0_1 = arith.constant 0 : index
    %c0_2 = arith.constant 0 : index
    %2 = vector.load %arg6[%c0_1, %c0_2] : memref<16x64xbf16, #tpu.memory_space<vmem>>, vector<16x64xbf16>
    %cst = arith.constant dense<0.000000e+00> : vector<32x64xf32>
    %3 = tpu.matmul %1, %2, %cst {dimension_numbers = #tpu.dot_dimension_numbers<[1], [0], [0], [1], [0, 0, 1, 1], [], []>} : vector<32x16xbf16>, vector<16x64xbf16>, vector<32x64xf32> -> vector<32x64xf32>
    %c0_3 = arith.constant 0 : index
    %c0_4 = arith.constant 0 : index
    %4 = vector.load %arg7[%c0_3, %c0_4] : memref<1x64xf32, #tpu.memory_space<vmem>>, vector<1x64xf32>
    %5 = vector.broadcast %4 : vector<1x64xf32> to vector<32x64xf32>
    %6 = arith.addf %3, %5 : vector<32x64xf32>
    %c0_i32 = arith.constant 0 : i32
    %c3_i32 = arith.constant 3 : i32
    %7 = arith.addi %c0_i32, %c3_i32 : i32
    %c1_i32 = arith.constant 1 : i32
    %8 = scf.for %arg25 = %c0_i32 to %7 step %c1_i32 iter_args(%arg26 = %6) -> (vector<32x64xf32>)  : i32 {
      %25 = arith.truncf %arg26 : vector<32x64xf32> to vector<32x64xbf16>
      %26 = arith.index_cast %arg25 : i32 to index
      %c0_26 = arith.constant 0 : index
      %c0_27 = arith.constant 0 : index
      %27 = vector.load %arg8[%26, %c0_26, %c0_27] : memref<3x64x64xbf16, #tpu.memory_space<vmem>>, vector<1x64x64xbf16>
      %28 = vector.shape_cast %27 : vector<1x64x64xbf16> to vector<64x64xbf16>
      %cst_28 = arith.constant dense<0.000000e+00> : vector<32x64xf32>
      %29 = tpu.matmul %25, %28, %cst_28 {dimension_numbers = #tpu.dot_dimension_numbers<[1], [0], [0], [1], [0, 0, 1, 1], [], []>} : vector<32x64xbf16>, vector<64x64xbf16>, vector<32x64xf32> -> vector<32x64xf32>
      %30 = vector.extract_strided_slice %29 {offsets = [0, 0], sizes = [32, 32], strides = [1, 1]} : vector<32x64xf32> to vector<32x32xf32>
      %c0_29 = arith.constant 0 : index
      %c0_30 = arith.constant 0 : index
      %31 = vector.load %arg20[%c0_29, %c0_30] : memref<32x32xf32, #tpu.memory_space<vmem>>, vector<32x32xf32>
      tpu.vector_store %arg20[%c0_29, %c0_30], %30 {strides = array<i32>} : memref<32x32xf32, #tpu.memory_space<vmem>>, vector<32x32xf32>,
      %32 = vector.extract_strided_slice %29 {offsets = [0, 32], sizes = [32, 32], strides = [1, 1]} : vector<32x64xf32> to vector<32x32xf32>
      %c0_31 = arith.constant 0 : index
      %c0_32 = arith.constant 0 : index
      %33 = vector.load %arg21[%c0_31, %c0_32] : memref<32x32xf32, #tpu.memory_space<vmem>>, vector<32x32xf32>
      tpu.vector_store %arg21[%c0_31, %c0_32], %32 {strides = array<i32>} : memref<32x32xf32, #tpu.memory_space<vmem>>, vector<32x32xf32>,
      %34 = arith.index_cast %arg25 : i32 to index
      %c0_33 = arith.constant 0 : index
      %c0_34 = arith.constant 0 : index
      %35 = vector.load %arg9[%34, %c0_33, %c0_34] : memref<3x1x32xf32, #tpu.memory_space<vmem>>, vector<1x1x32xf32>
      %36 = vector.shape_cast %35 : vector<1x1x32xf32> to vector<1x32xf32>
      %37 = arith.index_cast %arg25 : i32 to index
      %c0_35 = arith.constant 0 : index
      %c0_36 = arith.constant 0 : index
      %38 = vector.load %arg10[%37, %c0_35, %c0_36] : memref<3x1x32xf32, #tpu.memory_space<vmem>>, vector<1x1x32xf32>
      %39 = vector.shape_cast %38 : vector<1x1x32xf32> to vector<1x32xf32>
      %c0_i32_37 = arith.constant 0 : i32
      %c160_i32 = arith.constant 160 : i32
      %40 = arith.addi %c0_i32_37, %c160_i32 : i32
      %c1_i32_38 = arith.constant 1 : i32
      scf.for %arg27 = %c0_i32_37 to %40 step %c1_i32_38  : i32 {
        %87 = arith.index_cast %arg27 : i32 to index
        %88 = memref.load %arg2[%87] : memref<160xi32, #tpu.memory_space<smem>>
        %89 = arith.index_cast %arg27 : i32 to index
        %90 = memref.load %arg1[%89] : memref<160xi32, #tpu.memory_space<smem>>
        %91 = arith.index_cast %arg27 : i32 to index
        %92 = memref.load %arg4[%91] : memref<160xf32, #tpu.memory_space<smem>>
        %93 = arith.index_cast %88 : i32 to index
        %c0_72 = arith.constant 0 : index
        %94 = vector.load %arg20[%93, %c0_72] : memref<32x32xf32, #tpu.memory_space<vmem>>, vector<1x32xf32>
        %95 = arith.index_cast %90 : i32 to index
        %c0_73 = arith.constant 0 : index
        %96 = vector.load %arg21[%95, %c0_73] : memref<32x32xf32, #tpu.memory_space<vmem>>, vector<1x32xf32>
        %97 = arith.addf %94, %96 : vector<1x32xf32>
        %98 = vector.broadcast %92 : f32 to vector<1x32xf32>
        %99 = arith.mulf %98, %36 : vector<1x32xf32>
        %100 = arith.addf %97, %99 : vector<1x32xf32>
        %101 = arith.addf %100, %39 : vector<1x32xf32>
        %102 = arith.index_cast %arg27 : i32 to index
        %c0_74 = arith.constant 0 : index
        %103 = vector.load %arg22[%102, %c0_74] : memref<160x64xf32, #tpu.memory_space<vmem>>, vector<1x32xf32>
        tpu.vector_store %arg22[%102, %c0_74], %101 {strides = array<i32>} : memref<160x64xf32, #tpu.memory_space<vmem>>, vector<1x32xf32>,
      }
      %c160_i32_39 = arith.constant 160 : i32
      %c0_40 = arith.constant 0 : index
      %c0_41 = arith.constant 0 : index
      %41 = vector.load %arg22[%c0_40, %c0_41] : memref<160x64xf32, #tpu.memory_space<vmem>>, vector<160x32xf32>
      %cst_42 = arith.constant 0.000000e+00 : f32
      %42 = vector.broadcast %cst_42 : f32 to vector<160x32xf32>
      %43 = arith.maximumf %41, %42 : vector<160x32xf32>
      %44 = arith.truncf %43 : vector<160x32xf32> to vector<160x32xbf16>
      %45 = arith.index_cast %arg25 : i32 to index
      %c0_43 = arith.constant 0 : index
      %c0_44 = arith.constant 0 : index
      %46 = vector.load %arg11[%45, %c0_43, %c0_44] : memref<3x32x64xbf16, #tpu.memory_space<vmem>>, vector<1x32x64xbf16>
      %47 = vector.shape_cast %46 : vector<1x32x64xbf16> to vector<32x64xbf16>
      %cst_45 = arith.constant dense<0.000000e+00> : vector<160x64xf32>
      %48 = tpu.matmul %44, %47, %cst_45 {dimension_numbers = #tpu.dot_dimension_numbers<[1], [0], [0], [1], [0, 0, 1, 1], [], []>} : vector<160x32xbf16>, vector<32x64xbf16>, vector<160x64xf32> -> vector<160x64xf32>
      %49 = arith.index_cast %arg25 : i32 to index
      %c0_46 = arith.constant 0 : index
      %c0_47 = arith.constant 0 : index
      %50 = vector.load %arg12[%49, %c0_46, %c0_47] : memref<3x1x64xf32, #tpu.memory_space<vmem>>, vector<1x1x64xf32>
      %51 = vector.shape_cast %50 : vector<1x1x64xf32> to vector<1x64xf32>
      %52 = vector.broadcast %51 : vector<1x64xf32> to vector<160x64xf32>
      %53 = arith.addf %48, %52 : vector<160x64xf32>
      %cst_48 = arith.constant 0.000000e+00 : f32
      %54 = vector.broadcast %cst_48 : f32 to vector<160x64xf32>
      %55 = arith.maximumf %53, %54 : vector<160x64xf32>
      %c0_49 = arith.constant 0 : index
      %c0_50 = arith.constant 0 : index
      %56 = vector.load %arg22[%c0_49, %c0_50] : memref<160x64xf32, #tpu.memory_space<vmem>>, vector<160x64xf32>
      tpu.vector_store %arg22[%c0_49, %c0_50], %55 {strides = array<i32>} : memref<160x64xf32, #tpu.memory_space<vmem>>, vector<160x64xf32>,
      %cst_51 = arith.constant 0.000000e+00 : f32
      %57 = vector.broadcast %cst_51 : f32 to vector<32x64xf32>
      %c0_52 = arith.constant 0 : index
      %c0_53 = arith.constant 0 : index
      %58 = vector.load %arg23[%c0_52, %c0_53] : memref<32x64xf32, #tpu.memory_space<vmem>>, vector<32x64xf32>
      tpu.vector_store %arg23[%c0_52, %c0_53], %57 {strides = array<i32>} : memref<32x64xf32, #tpu.memory_space<vmem>>, vector<32x64xf32>,
      %c0_i32_54 = arith.constant 0 : i32
      %c160_i32_55 = arith.constant 160 : i32
      %59 = arith.addi %c0_i32_54, %c160_i32_55 : i32
      %c1_i32_56 = arith.constant 1 : i32
      scf.for %arg27 = %c0_i32_54 to %59 step %c1_i32_56  : i32 {
        %87 = arith.index_cast %arg27 : i32 to index
        %88 = memref.load %arg2[%87] : memref<160xi32, #tpu.memory_space<smem>>
        %89 = arith.index_cast %88 : i32 to index
        %c0_72 = arith.constant 0 : index
        %90 = vector.load %arg23[%89, %c0_72] : memref<32x64xf32, #tpu.memory_space<vmem>>, vector<1x64xf32>
        %91 = arith.index_cast %arg27 : i32 to index
        %c0_73 = arith.constant 0 : index
        %92 = vector.load %arg22[%91, %c0_73] : memref<160x64xf32, #tpu.memory_space<vmem>>, vector<1x64xf32>
        %93 = arith.addf %90, %92 : vector<1x64xf32>
        %94 = arith.index_cast %88 : i32 to index
        %c0_74 = arith.constant 0 : index
        %95 = vector.load %arg23[%94, %c0_74] : memref<32x64xf32, #tpu.memory_space<vmem>>, vector<1x64xf32>
        tpu.vector_store %arg23[%94, %c0_74], %93 {strides = array<i32>} : memref<32x64xf32, #tpu.memory_space<vmem>>, vector<1x64xf32>,
      }
      %c160_i32_57 = arith.constant 160 : i32
      %c0_58 = arith.constant 0 : index
      %c0_59 = arith.constant 0 : index
      %60 = vector.load %arg23[%c0_58, %c0_59] : memref<32x64xf32, #tpu.memory_space<vmem>>, vector<32x64xf32>
      %61 = tpu.concatenate %arg26, %60 in 1 : vector<32x64xf32>, vector<32x64xf32> -> vector<32x128xf32>
      %62 = arith.truncf %61 : vector<32x128xf32> to vector<32x128xbf16>
      %63 = arith.index_cast %arg25 : i32 to index
      %c0_60 = arith.constant 0 : index
      %c0_61 = arith.constant 0 : index
      %64 = vector.load %arg13[%63, %c0_60, %c0_61] : memref<3x128x32xbf16, #tpu.memory_space<vmem>>, vector<1x128x32xbf16>
      %65 = vector.shape_cast %64 : vector<1x128x32xbf16> to vector<128x32xbf16>
      %cst_62 = arith.constant dense<0.000000e+00> : vector<32x32xf32>
      %66 = tpu.matmul %62, %65, %cst_62 {dimension_numbers = #tpu.dot_dimension_numbers<[1], [0], [0], [1], [0, 0, 1, 1], [], []>} : vector<32x128xbf16>, vector<128x32xbf16>, vector<32x32xf32> -> vector<32x32xf32>
      %67 = arith.index_cast %arg25 : i32 to index
      %c0_63 = arith.constant 0 : index
      %c0_64 = arith.constant 0 : index
      %68 = vector.load %arg14[%67, %c0_63, %c0_64] : memref<3x1x32xf32, #tpu.memory_space<vmem>>, vector<1x1x32xf32>
      %69 = vector.shape_cast %68 : vector<1x1x32xf32> to vector<1x32xf32>
      %70 = vector.broadcast %69 : vector<1x32xf32> to vector<32x32xf32>
      %71 = arith.addf %66, %70 : vector<32x32xf32>
      %cst_65 = arith.constant 0.000000e+00 : f32
      %72 = vector.broadcast %cst_65 : f32 to vector<32x32xf32>
      %73 = arith.maximumf %71, %72 : vector<32x32xf32>
      %74 = arith.truncf %73 : vector<32x32xf32> to vector<32x32xbf16>
      %75 = arith.index_cast %arg25 : i32 to index
      %c0_66 = arith.constant 0 : index
      %c0_67 = arith.constant 0 : index
      %76 = vector.load %arg15[%75, %c0_66, %c0_67] : memref<3x32x64xbf16, #tpu.memory_space<vmem>>, vector<1x32x64xbf16>
      %77 = vector.shape_cast %76 : vector<1x32x64xbf16> to vector<32x64xbf16>
      %cst_68 = arith.constant dense<0.000000e+00> : vector<32x64xf32>
      %78 = tpu.matmul %74, %77, %cst_68 {dimension_numbers = #tpu.dot_dimension_numbers<[1], [0], [0], [1], [0, 0, 1, 1], [], []>} : vector<32x32xbf16>, vector<32x64xbf16>, vector<32x64xf32> -> vector<32x64xf32>
      %79 = arith.index_cast %arg25 : i32 to index
      %c0_69 = arith.constant 0 : index
      %c0_70 = arith.constant 0 : index
      %80 = vector.load %arg16[%79, %c0_69, %c0_70] : memref<3x1x64xf32, #tpu.memory_space<vmem>>, vector<1x1x64xf32>
      %81 = vector.shape_cast %80 : vector<1x1x64xf32> to vector<1x64xf32>
      %82 = vector.broadcast %81 : vector<1x64xf32> to vector<32x64xf32>
      %83 = arith.addf %78, %82 : vector<32x64xf32>
      %cst_71 = arith.constant 0.000000e+00 : f32
      %84 = vector.broadcast %cst_71 : f32 to vector<32x64xf32>
      %85 = arith.maximumf %83, %84 : vector<32x64xf32>
      %86 = arith.addf %arg26, %85 : vector<32x64xf32>
      scf.yield %86 : vector<32x64xf32>
    }
    %c3_i32_5 = arith.constant 3 : i32
    %c0_6 = arith.constant 0 : index
    %c0_7 = arith.constant 0 : index
    %9 = vector.load %arg23[%c0_6, %c0_7] : memref<32x64xf32, #tpu.memory_space<vmem>>, vector<32x64xf32>
    tpu.vector_store %arg23[%c0_6, %c0_7], %8 {strides = array<i32>} : memref<32x64xf32, #tpu.memory_space<vmem>>, vector<32x64xf32>,
    %cst_8 = arith.constant 0.000000e+00 : f32
    %10 = vector.broadcast %cst_8 : f32 to vector<2x64xf32>
    %c0_9 = arith.constant 0 : index
    %c0_10 = arith.constant 0 : index
    %11 = vector.load %arg24[%c0_9, %c0_10] : memref<2x64xf32, #tpu.memory_space<vmem>>, vector<2x64xf32>
    tpu.vector_store %arg24[%c0_9, %c0_10], %10 {strides = array<i32>} : memref<2x64xf32, #tpu.memory_space<vmem>>, vector<2x64xf32>,
    %c0_i32_11 = arith.constant 0 : i32
    %c32_i32 = arith.constant 32 : i32
    %12 = arith.addi %c0_i32_11, %c32_i32 : i32
    %c1_i32_12 = arith.constant 1 : i32
    scf.for %arg25 = %c0_i32_11 to %12 step %c1_i32_12  : i32 {
      %25 = arith.index_cast %arg25 : i32 to index
      %26 = memref.load %arg3[%25] : memref<32xi32, #tpu.memory_space<smem>>
      %27 = arith.index_cast %26 : i32 to index
      %c0_26 = arith.constant 0 : index
      %28 = vector.load %arg24[%27, %c0_26] : memref<2x64xf32, #tpu.memory_space<vmem>>, vector<1x64xf32>
      %29 = arith.index_cast %arg25 : i32 to index
      %c0_27 = arith.constant 0 : index
      %30 = vector.load %arg23[%29, %c0_27] : memref<32x64xf32, #tpu.memory_space<vmem>>, vector<1x64xf32>
      %31 = arith.addf %28, %30 : vector<1x64xf32>
      %32 = arith.index_cast %26 : i32 to index
      %c0_28 = arith.constant 0 : index
      %33 = vector.load %arg24[%32, %c0_28] : memref<2x64xf32, #tpu.memory_space<vmem>>, vector<1x64xf32>
      tpu.vector_store %arg24[%32, %c0_28], %31 {strides = array<i32>} : memref<2x64xf32, #tpu.memory_space<vmem>>, vector<1x64xf32>,
    }
    %c32_i32_13 = arith.constant 32 : i32
    %c0_14 = arith.constant 0 : index
    %c0_15 = arith.constant 0 : index
    %13 = vector.load %arg24[%c0_14, %c0_15] : memref<2x64xf32, #tpu.memory_space<vmem>>, vector<2x64xf32>
    %c0_16 = arith.constant 0 : index
    %c0_17 = arith.constant 0 : index
    %14 = vector.load %arg5[%c0_16, %c0_17] : memref<2x1xf32, #tpu.memory_space<vmem>>, vector<2x1xf32>
    %15 = vector.broadcast %14 : vector<2x1xf32> to vector<2x64xf32>
    %16 = arith.mulf %13, %15 : vector<2x64xf32>
    %c0_18 = arith.constant 0 : index
    %c0_19 = arith.constant 0 : index
    %17 = vector.load %arg17[%c0_18, %c0_19] : memref<64x1xf32, #tpu.memory_space<vmem>>, vector<64x1xf32>
    %cst_20 = arith.constant dense<0.000000e+00> : vector<2x1xf32>
    %18 = tpu.matmul %16, %17, %cst_20 {dimension_numbers = #tpu.dot_dimension_numbers<[1], [0], [0], [1], [0, 0, 1, 1], [], []>} : vector<2x64xf32>, vector<64x1xf32>, vector<2x1xf32> -> vector<2x1xf32>
    %c0_21 = arith.constant 0 : index
    %c0_22 = arith.constant 0 : index
    %19 = vector.load %arg18[%c0_21, %c0_22] : memref<1x1xf32, #tpu.memory_space<vmem>>, vector<1x1xf32>
    %20 = vector.broadcast %19 : vector<1x1xf32> to vector<2x1xf32>
    %21 = arith.addf %18, %20 : vector<2x1xf32>
    %cst_23 = arith.constant 0.000000e+00 : f32
    %22 = vector.broadcast %cst_23 : f32 to vector<2x1xf32>
    %23 = arith.maximumf %21, %22 : vector<2x1xf32>
    %c0_24 = arith.constant 0 : index
    %c0_25 = arith.constant 0 : index
    %24 = vector.load %arg19[%c0_24, %c0_25] : memref<2x1xf32, #tpu.memory_space<vmem>>, vector<2x1xf32>
    tpu.vector_store %arg19[%c0_24, %c0_25], %23 {strides = array<i32>} : memref<2x1xf32, #tpu.memory_space<vmem>>, vector<2x1xf32>,
    return
  }
}

</mosaic_0001>

<bundles_post_ra>
// kernel: mpnn_forward.1
= control target key start
LH: loop header
LB: loop body
LE: loop exit
PB: predicated region body
PF: predicated region fallthrough
CT: control target
= control target key end

     0   :  { %s1787_s0 = inlined_call_operand.vmem [shape: f32[32,16], index: 0, kind: input, shape index: {}]   ;;  %s1788_s1 = inlined_call_operand.vmem [shape: s32[160], index: 1, kind: input, shape index: {}]   ;;  %s1789_s2 = inlined_call_operand.vmem [shape: s32[160], index: 2, kind: input, shape index: {}]   ;;  %s1790_s3 = inlined_call_operand.vmem [shape: s32[32], index: 3, kind: input, shape index: {}]   ;;  %s1791_s4 = inlined_call_operand.vmem [shape: f32[160], index: 4, kind: input, shape index: {}]   ;;  %s1792_s5 = inlined_call_operand.vmem [shape: f32[2,1], index: 5, kind: input, shape index: {}]   ;;  %s1793_s6 = inlined_call_operand.vmem [shape: bf16[16,64], index: 6, kind: input, shape index: {}]   ;;  %s1794_s7 = inlined_call_operand.vmem [shape: f32[1,64], index: 7, kind: input, shape index: {}]   ;;  %s1795_s8 = inlined_call_operand.vmem [shape: bf16[3,64,64], index: 8, kind: input, shape index: {}]   ;;  %s1796_s9 = inlined_call_operand.vmem [shape: f32[3,1,32], index: 9, kind: input, shape index: {}]   ;;  %s1797_s10 = inlined_call_operand.vmem [shape: f32[3,1,32], index: 10, kind: input, shape index: {}]   ;;  %s1798_s11 = inlined_call_operand.vmem [shape: bf16[3,32,64], index: 11, kind: input, shape index: {}]   ;;  %s1799_s12 = inlined_call_operand.vmem [shape: f32[3,1,64], index: 12, kind: input, shape index: {}]   ;;  %s1800_s13 = inlined_call_operand.vmem [shape: bf16[3,128,32], index: 13, kind: input, shape index: {}]   ;;  %s1801_s14 = inlined_call_operand.vmem [shape: f32[3,1,32], index: 14, kind: input, shape index: {}]   ;;  %s1802_s15 = inlined_call_operand.vmem [shape: bf16[3,32,64], index: 15, kind: input, shape index: {}]   ;;  %s1803_s16 = inlined_call_operand.vmem [shape: f32[3,1,64], index: 16, kind: input, shape index: {}]   ;;  %s1804_s17 = inlined_call_operand.vmem [shape: f32[64,1], index: 17, kind: input, shape index: {}]   ;;  %s1805_s18 = inlined_call_operand.<no memory space> [shape: f32[1,1], index: 18, kind: input, shape index: {}]   ;;  %s1806_s19 = inlined_call_operand.vmem [shape: f32[2,1], index: 19, kind: output, shape index: {}]  }
   0x1   :  { %1808 = sst [smem:[#allocation18_spill]] %s1787_s0  ;;  %v24_v0 = vstv %s1805_s18 }
   0x2   :  { %1809 = sst [smem:[#allocation19_spill]] %s1788_s1  ;;  %25 = vst [vmem:[#allocation7] sm:$0x1] %v24_v0 }
   0x3   :  { %1810 = sst [smem:[#allocation20_spill]] %s1789_s2 }
   0x4   :  { %1811 = sst [smem:[#allocation21_spill]] %s1790_s3 }
   0x5   :  { %26 = vsyncpa [#allocation9], 0 }
   0x6   :  { %27 = vsyncpa [#allocation11], 0  ;;  %s1812_s1 = sld [smem:[#allocation20_spill]] }
   0xc   :  { %s47_s22 = sshll.u32 %s1812_s1, 4  ;;  %s48_s22 = int_to_ptr.vmem [resolvable:$true] %s47_s22 }
   0xd   :  { %28 = vsyncpa [#allocation14], 0  ;;  %s1813_s24 = sld [smem:[#allocation19_spill]]  ;;  %s1330_s3 = scalar_lea.vmem %s48_s22, 32 }
   0xe   :  { %p1331_p0 = scmp.ne.s32.totalorder %s48_s22, %s1330_s3  ;;  %p1335_p1 = scmp.lt.s32.totalorder %s48_s22, %s48_s22 }
   0xf   :  { %p1336_p2 = scmp.lt.s32.totalorder %s1330_s3, %s1330_s3 }
  0x11   :  { %p1337_p3 = por %p1336_p2, %p1335_p1 }
  0x13   :  { %s37_s25 = sshll.u32 %s1813_s24, 4  ;;  %p1338_p4 = pnand %p1337_p3, %p1331_p0  ;;  %s38_s25 = int_to_ptr.vmem [resolvable:$true] %s37_s25 }
  0x15   :  { %1341 = shalt.err (!%p1338_p4)
}
  0x16   :  { %s1448_s18 = smov [#allocation10]   ;;  %s1342_s26 = scalar_lea.vmem %s38_s25, 32 }
  0x17   :  { %50 = dma.vmem_to_smem %s48_s22, 32, %s1448_s18, [#allocation11]  }
  0x18   :  { %p1343_p5 = scmp.ne.s32.totalorder %s38_s25, %s1342_s26  ;;  %p1347_p6 = scmp.lt.s32.totalorder %s38_s25, %s38_s25 }
  0x19   :  { %p1348_p7 = scmp.lt.s32.totalorder %s1342_s26, %s1342_s26 }
  0x1b   :  { %p1349_p8 = por %p1348_p7, %p1347_p6 }
  0x1d   :  { %p1350_p9 = pnand %p1349_p8, %p1343_p5 }
  0x1f   :  { %1353 = shalt.err (!%p1350_p9)
}
  0x20   :  { %s1449_s27 = smov [#allocation8]   ;;  %s1814_s0 = sld [smem:[#allocation21_spill]] }
  0x21   :  { %40 = dma.vmem_to_smem %s38_s25, 32, %s1449_s27, [#allocation9]  }
  0x22   :  { %s67_s1 = sshll.u32 %s1791_s4, 4  ;;  %s68_s1 = int_to_ptr.vmem [resolvable:$true] %s67_s1 }
  0x26   :  { %s57_s30 = sshll.u32 %s1814_s0, 4  ;;  %s58_s30 = int_to_ptr.vmem [resolvable:$true] %s57_s30 }
  0x27   :  { %s1354_s22 = scalar_lea.vmem %s58_s30, 16  ;;  %p1359_p11 = scmp.lt.s32.totalorder %s58_s30, %s58_s30 }
  0x28   :  { %p1355_p10 = scmp.ne.s32.totalorder %s58_s30, %s1354_s22  ;;  %p1360_p12 = scmp.lt.s32.totalorder %s1354_s22, %s1354_s22 }
  0x2a   :  { %p1361_p13 = por %p1360_p12, %p1359_p11 }
  0x2c   :  { %p1362_p0 = pnand %p1361_p13, %p1355_p10 }
  0x2e   :  { %1365 = shalt.err (!%p1362_p0)
}
  0x2f   :  { %s1450_s2 = smov [#allocation12]   ;;  %s1366_s23 = scalar_lea.vmem %s68_s1, 32 }
  0x30   :  { %60 = dma.vmem_to_smem %s58_s30, 16, %s1450_s2, [#allocation11]  }
  0x31   :  { %p1367_p1 = scmp.ne.s32.totalorder %s68_s1, %s1366_s23  ;;  %p1371_p2 = scmp.lt.s32.totalorder %s68_s1, %s68_s1 }
  0x32   :  { %p1372_p3 = scmp.lt.s32.totalorder %s1366_s23, %s1366_s23 }
  0x34   :  { %p1373_p4 = por %p1372_p3, %p1371_p2 }
  0x36   :  { %p1374_p5 = pnand %p1373_p4, %p1367_p1 }
  0x38   :  { %1377 = shalt.err (!%p1374_p5)
}
  0x39   :  { %s1451_s24 = smov [#allocation13]  }
  0x3a   :  { %70 = dma.vmem_to_smem %s68_s1, 32, %s1451_s24, [#allocation14]  }
  0x3b   :  { %1410 = dma.done.wait [#allocation9], 32  }
  0x3c   :  { %1411 = vsyncadd [#allocation9], 4294967264 }
  0x3d   :  { %1412 = dma.done.wait [#allocation11], 48  }
  0x3e   :  { %1413 = vsyncadd [#allocation11], 4294967248 }
  0x3f   :  { %1414 = dma.done.wait [#allocation14], 32  }
  0x40   :  { %1415 = vsyncadd [#allocation14], 4294967264 }
  0x41   :  { %111 = sfence }
  0x42   :  { %v1302_v1 = vld [vmem:[%s1793_s6] sm:$0xff]   ;;  %s1815_s26 = sld [smem:[#allocation18_spill]]  ;;  %vm134_vm0 = vcmask 130048   ;;  %s1599_s1 = smov 0  }
  0x43   :  { %1139 = vmatprep.subr.bf16.mxu0 %v1302_v1  ;;  %v1045_v8 = vld [vmem:[%s1794_s7] ss:$0 sm:$0xff] }
  0x44   :  { %1140 = vmatpush3.bf16.msra.mxu0 %v1302_v1 }
  0x48   :  { %v113_v2 = vld [vmem:[%s1815_s26] sm:$0xff]  ;;  %v114_v3 = vld [vmem:[%s1815_s26 + $0x8] sm:$0xff]  ;;  %v115_v4 = vld [vmem:[%s1815_s26 + $0x10] sm:$0xff] }
  0x49   :  { %v117_v5 = vpack.c.bf16 %v114_v3, %v113_v2  ;;  %v116_v6 = vld [vmem:[%s1815_s26 + $0x18] sm:$0xff] }
  0x4a   :  { %v118_v7 = vpack.c.bf16 %v116_v6, %v115_v4 }
  0x4b   :  { %1141 = vmatprep.mubr.msk.bf16.mxu0 %vm134_vm0, %v117_v5 }
  0x4c   :  { %1142 = vmatmul.mubr.msk.bf16.vlgmr.msra.gmra.mxu0 %vm134_vm0, %v118_v7 }
 0x10c   :  { %v1143_v9 = vpop.f32.mrf.mxu0 }
 0x10d   :  { %v184_v10 = vadd.f32 %v1143_v9, %v1045_v8  }
 0x10e   :  { %v175_v11 = vpop.f32.mrf.mxu0 }
 0x10f   :  { %v176_v12 = vadd.f32 %v1045_v8, %v175_v11  }
 0x110   :  { %v1144_v13 = vpop.f32.mrf.mxu0 }
 0x111   :  { %v187_v14 = vadd.f32 %v1144_v13, %v1045_v8  }
 0x112   :  { %v178_v15 = vpop.f32.mrf.mxu0 }
 0x113   :  { %v179_v16 = vadd.f32 %v1045_v8, %v178_v15  }
 0x114 LB: > { %vm237_vm1 = vcmask 523264   ;;  %s1091_s7 = sshll.u32 %s1434_s1, 5  ;;  %s318_s23 = scalar_lea.vmem %s1796_s9, %s1434_s1  ;;  %v200_v17 = vpack.c.bf16 %v1426_v16, %v1430_v12  ;;  %v201_v24 = vpack.c.bf16 %v1418_v14, %v1422_v10  ;;  %vm293_vm2 = vcmask 261120   ;;  %s1434_s1 = sphi %s1599_s1, %s195_s1   ;;  %v1430_v12 = vphi %v176_v12, %v1819_v12   ;;  %v1426_v16 = vphi %v179_v16, %v1818_v16   ;;  %v1422_v10 = vphi %v184_v10, %v1817_v10   ;;  %v1418_v14 = vphi %v187_v14, %v1816_v14  }
 0x115   : > { %s204_s25 = scalar_lea.vmem %s1795_s8, %s1091_s7  ;;  %v319_v18 = vld [vmem:[%s318_s23] sm:$0x1]  ;;  %s320_s26 = scalar_lea.vmem %s1797_s10, %s1434_s1 }
 0x116   : > { %v1303_v19 = vld [vmem:[%s204_s25 + $0x18] sm:$0xff]   ;;  %1153 = vmatprep.mubr.msk.bf16.mxu0 %vm237_vm1, %v200_v17  ;;  %v321_v20 = vld [vmem:[%s320_s26] sm:$0x1]  ;;  %v1304_v21 = vld [vmem:[%s204_s25 + $0x10] sm:$0xff]   ;;  %s1452_s27 = smov 96   ;;  %s1436_s28 = smov 0  }
 0x117   : > { %1145 = vmatprep.subr.bf16.mxu0 %v1303_v19  ;;  %v1305_v22 = vld [vmem:[%s204_s25 + $0x8] sm:$0xff]   ;;  %v1306_v23 = vld [vmem:[%s204_s25] sm:$0xff]  }
 0x118   : > { %1146 = vmatpush3.bf16.msra.mxu0 %v1303_v19 }
 0x119   : > { %1147 = vmatprep.subr.bf16.mxu0 %v1304_v21 }
 0x11c   : > { %1148 = vmatpush3.bf16.msra.mxu0 %v1304_v21 }
 0x11d   : > { %1149 = vmatprep.subr.bf16.mxu0 %v1305_v22 }
 0x120   : > { %1150 = vmatpush3.bf16.msra.mxu0 %v1305_v22 }
 0x121   : > { %1151 = vmatprep.subr.bf16.mxu0 %v1306_v23 }
 0x124   : > { %1152 = vmatpush3.bf16.msra.mxu0 %v1306_v23 }
 0x127   : > { %1154 = vmatmul.mubr.msk.bf16.vlgmr.msra.gmra.mxu0 %vm237_vm1, %v201_v24 }
 0x1e7   : > { %v1155_v25 = vpop.f32.mrf.mxu0 }
 0x1e8   : > { %296 = vst.msk [vmem:[#allocation2 + $0x10] sm:$0xff] %vm293_vm2, %v1155_v25  ;;  %306 = vrot.lane.b32.xlu1 %v1155_v25, %s1452_s27 }
 0x1e9   : > { %v278_v26 = vpop.f32.mrf.mxu0 }
 0x1ea   : > { %294 = vst.msk [vmem:[#allocation2] sm:$0xff] %vm293_vm2, %v278_v26  ;;  %302 = vrot.lane.b32.xlu0 %v278_v26, %s1452_s27 }
 0x1eb   : > { %v1156_v27 = vpop.f32.mrf.mxu0 }
 0x1ec   : > { %297 = vst.msk [vmem:[#allocation2 + $0x18] sm:$0xff] %vm293_vm2, %v1156_v27  ;;  %308 = vrot.lane.b32.xlu1 %v1156_v27, %s1452_s27 }
 0x1ed   : > { %v281_v28 = vpop.f32.mrf.mxu0 }
 0x1ee   : > { %295 = vst.msk [vmem:[#allocation2 + $0x8] sm:$0xff] %vm293_vm2, %v281_v28  ;;  %304 = vrot.lane.b32.xlu0 %v281_v28, %s1452_s27 }
 0x25a   : > { %v307_v29 = vpop.permute.xlu1 %306 }
 0x25b   : > { %316 = vst.msk [vmem:[#allocation3 + $0x10] sm:$0xff] %vm293_vm2, %v307_v29 }
 0x25c   : > { %v303_v30 = vpop.permute.xlu0 %302 }
 0x25d   : > { %314 = vst.msk [vmem:[#allocation3] sm:$0xff] %vm293_vm2, %v303_v30 }
 0x25e   : > { %v309_v31 = vpop.permute.xlu1 %308 }
 0x25f   : > { %317 = vst.msk [vmem:[#allocation3 + $0x18] sm:$0xff] %vm293_vm2, %v309_v31 }
 0x260   : > { %v305_v32 = vpop.permute.xlu0 %304 }
 0x261   : > { %315 = vst.msk [vmem:[#allocation3 + $0x8] sm:$0xff] %vm293_vm2, %v305_v32 }
 0x262 LB: >> { %s328_s29 = sld [smem:[#allocation10 + %s1438_s28]]  ;;  %vm341_vm3 = vcmask 253952   ;;  %s340_s21 = scalar_lea.vmem [#allocation4], %s1438_s28  ;;  %s1438_s28 = sphi %s1436_s28, %s327_s28  }
 0x263   : >> { %s329_s0 = sld [smem:[#allocation8 + %s1438_s28]] }
 0x264   : >> { %s330_s30 = sld [smem:[#allocation13 + %s1438_s28]]  ;;  %s327_s28 = sadd.s32 1, %s1438_s28  }
 0x265   : >> { %p324_p6 = scmp.ge.s32.totalorder %s327_s28, 160  }
 0x266   : > { %s1092_s7 = sshll.u32 (%p324_p6), %s1434_s1, 4  ;;  %v1453_v32 = vmov (%p324_p6), 0.0   ;;  %s400_s25 = scalar_lea.vmem (%p324_p6), %s1799_s12, %s1434_s1 }
 0x267   : > { %s395_s23 = scalar_lea.vmem (%p324_p6), %s1798_s11, %s1092_s7  ;;  %603 = vst.msk [vmem:[#allocation5] sm:$0xff] (%p324_p6), %vm237_vm1, %v1453_v32  ;;  %604 = vst.msk [vmem:[#allocation5 + $0x8] sm:$0xff] (%p324_p6), %vm237_vm1, %v1453_v32  ;;  %s1440_s3 = smov (%p324_p6), 0  }
 0x268   : >> { %s331_s20 = scalar_lea.vmem [#allocation2], %s328_s29  ;;  %v1307_v48 = vld [vmem:[%s395_s23 + $0x8] sm:$0xff] (%p324_p6)   ;;  %v1308_v49 = vld [vmem:[%s395_s23] sm:$0xff] (%p324_p6)   ;;  %605 = vst.msk [vmem:[#allocation5 + $0x10] sm:$0xff] (%p324_p6), %vm237_vm1, %v1453_v32  ;;  %606 = vst.msk [vmem:[#allocation5 + $0x18] sm:$0xff] (%p324_p6), %vm237_vm1, %v1453_v32 }
 0x269   : >> { %v332_v33 = vld [vmem:[%s331_s20] sm:$0x1]  ;;  %s333_s6 = scalar_lea.vmem [#allocation3], %s329_s0  ;;  %1157 = vmatprep.subr.bf16.mxu1 (%p324_p6), %v1307_v48 }
 0x26a   : >> { %v334_v34 = vld [vmem:[%s333_s6] sm:$0x1]  ;;  %v336_v35 = vstv %s330_s30  ;;  %1158 = vmatpush3.bf16.msra.mxu1 (%p324_p6), %v1307_v48 }
 0x26b   : >> { %v335_v36 = vadd.f32 %v334_v34, %v332_v33  ;;  %v337_v37 = vmul.f32 %v336_v35, %v319_v18  ;;  %1159 = vmatprep.subr.bf16.mxu1 (%p324_p6), %v1308_v49  ;;  %v1666_v33 = vld [vmem:[%s400_s25] ss:$0 sm:$0xff] (%p324_p6) }
 0x26d   : >> { %v338_v38 = vadd.f32 %v337_v37, %v335_v36  ;;  %326 = sbr.rel (!%p324_p6) target bundleno = 610 (0x262), region = 156 }
 0x26e   : > { %1160 = vmatpush3.bf16.msra.mxu1 (%p324_p6), %v1308_v49 }
 0x26f   : >> { %v339_v39 = vadd.f32 %v338_v38, %v321_v20 }
 0x271   : >> { %342 = vst.msk [vmem:[%s340_s21] sm:$0x1] %vm341_vm3, %v339_v39 }
 0x278   : > { %v343_v40 = vld [vmem:[#allocation4] sm:$0xff]  ;;  %v344_v41 = vld [vmem:[#allocation4 + $0x8] sm:$0xff]  ;;  %v345_v42 = vld [vmem:[#allocation4 + $0x10] sm:$0xff] }
 0x279   : > { %v363_v43 = vmax.f32 %v343_v40, 0.0  ;;  %v364_v44 = vmax.f32 %v344_v41, 0.0  ;;  %v346_v45 = vld [vmem:[#allocation4 + $0x18] sm:$0xff]  ;;  %v347_v46 = vld [vmem:[#allocation4 + $0x20] sm:$0xff]  ;;  %v348_v47 = vld [vmem:[#allocation4 + $0x28] sm:$0xff]  ;;  %v365_v51 = vmax.f32 %v345_v42, 0.0 }
 0x27a   : > { %v366_v52 = vmax.f32 %v346_v45, 0.0  ;;  %v367_v53 = vmax.f32 %v347_v46, 0.0  ;;  %v368_v54 = vmax.f32 %v348_v47, 0.0  ;;  %v349_v57 = vld [vmem:[#allocation4 + $0x30] sm:$0xff]  ;;  %v350_v58 = vld [vmem:[#allocation4 + $0x38] sm:$0xff]  ;;  %v351_v59 = vld [vmem:[#allocation4 + $0x40] sm:$0xff] }
 0x27b   : > { %v383_v50 = vpack.c.bf16 %v364_v44, %v363_v43  ;;  %v352_v60 = vld [vmem:[#allocation4 + $0x48] sm:$0xff]  ;;  %v369_v61 = vmax.f32 %v349_v57, 0.0  ;;  %v370_v62 = vmax.f32 %v350_v58, 0.0  ;;  %v371_v63 = vmax.f32 %v351_v59, 0.0  ;;  %v353_v3 = vld [vmem:[#allocation4 + $0x50] sm:$0xff]  ;;  %v354_v4 = vld [vmem:[#allocation4 + $0x58] sm:$0xff] }
 0x27c   : > { %v384_v55 = vpack.c.bf16 %v366_v52, %v365_v51  ;;  %v385_v56 = vpack.c.bf16 %v368_v54, %v367_v53  ;;  %v372_v0 = vmax.f32 %v352_v60, 0.0  ;;  %v355_v5 = vld [vmem:[#allocation4 + $0x60] sm:$0xff]  ;;  %v356_v6 = vld [vmem:[#allocation4 + $0x68] sm:$0xff]  ;;  %v373_v7 = vmax.f32 %v353_v3, 0.0  ;;  %v357_v17 = vld [vmem:[#allocation4 + $0x70] sm:$0xff] }
 0x27d   : > { %1161 = vmatprep.mubr.msk.bf16.mxu1 %vm293_vm2, %v383_v50  ;;  %v386_v1 = vpack.c.bf16 %v370_v62, %v369_v61  ;;  %v374_v8 = vmax.f32 %v354_v4, 0.0  ;;  %v375_v9 = vmax.f32 %v355_v5, 0.0  ;;  %v376_v11 = vmax.f32 %v356_v6, 0.0  ;;  %v358_v18 = vld [vmem:[#allocation4 + $0x78] sm:$0xff]  ;;  %v359_v19 = vld [vmem:[#allocation4 + $0x80] sm:$0xff]  ;;  %v360_v20 = vld [vmem:[#allocation4 + $0x88] sm:$0xff] }
 0x27e   : > { %1162 = vmatmul.mubr.msk.bf16.vlgmr.msra.gmra.mxu1 %vm293_vm2, %v384_v55  ;;  %v387_v2 = vpack.c.bf16 %v372_v0, %v371_v63  ;;  %v377_v21 = vmax.f32 %v357_v17, 0.0  ;;  %v378_v22 = vmax.f32 %v358_v18, 0.0  ;;  %v379_v23 = vmax.f32 %v359_v19, 0.0  ;;  %v361_v27 = vld [vmem:[#allocation4 + $0x90] sm:$0xff]  ;;  %v362_v28 = vld [vmem:[#allocation4 + $0x98] sm:$0xff] }
 0x27f   : > { %1165 = vmatprep.mubr.msk.bf16.mxu1 %vm293_vm2, %v385_v56  ;;  %v388_v13 = vpack.c.bf16 %v374_v8, %v373_v7  ;;  %v389_v15 = vpack.c.bf16 %v376_v11, %v375_v9  ;;  %v380_v24 = vmax.f32 %v360_v20, 0.0  ;;  %v381_v29 = vmax.f32 %v361_v27, 0.0 }
 0x280   : > { %v390_v25 = vpack.c.bf16 %v378_v22, %v377_v21  ;;  %v382_v30 = vmax.f32 %v362_v28, 0.0 }
 0x281   : > { %v391_v26 = vpack.c.bf16 %v380_v24, %v379_v23 }
 0x282   : > { %v392_v31 = vpack.c.bf16 %v382_v30, %v381_v29 }
 0x286   : > { %1166 = vmatmul.mubr.msk.bf16.gmra.mxu1 %vm293_vm2, %v386_v1 }
 0x287   : > { %1169 = vmatprep.mubr.msk.bf16.mxu1 %vm293_vm2, %v387_v2 }
 0x28e   : > { %1170 = vmatmul.mubr.msk.bf16.gmra.mxu1 %vm293_vm2, %v388_v13 }
 0x28f   : > { %1173 = vmatprep.mubr.msk.bf16.mxu1 %vm293_vm2, %v389_v15 }
 0x296   : > { %1174 = vmatmul.mubr.msk.bf16.gmra.mxu1 %vm293_vm2, %v390_v25 }
 0x297   : > { %1177 = vmatprep.mubr.msk.bf16.mxu1 %vm293_vm2, %v391_v26 }
 0x29e   : > { %1178 = vmatmul.mubr.msk.bf16.gmra.mxu1 %vm293_vm2, %v392_v31 }
 0x33e   : > { %v1163_v34 = vpop.f32.mrf.mxu1 }
 0x33f   : > { %v493_v35 = vadd.f32 %v1163_v34, %v1666_v33 }
 0x340   : > { %v484_v36 = vpop.f32.mrf.mxu1 }
 0x341   : > { %v565_v37 = vmax.f32 %v493_v35, 0.0  ;;  %v485_v38 = vadd.f32 %v1666_v33, %v484_v36 }
 0x342   : > { %v1164_v39 = vpop.f32.mrf.mxu1 }
 0x343   : > { %585 = vst.msk [vmem:[#allocation4 + $0x10] sm:$0xff] %vm237_vm1, %v565_v37  ;;  %v563_v40 = vmax.f32 %v485_v38, 0.0  ;;  %v496_v41 = vadd.f32 %v1164_v39, %v1666_v33 }
 0x344   : > { %v487_v42 = vpop.f32.mrf.mxu1 }
 0x345   : > { %583 = vst.msk [vmem:[#allocation4] sm:$0xff] %vm237_vm1, %v563_v40  ;;  %v566_v43 = vmax.f32 %v496_v41, 0.0  ;;  %v488_v44 = vadd.f32 %v1666_v33, %v487_v42 }
 0x346   : > { %v1167_v45 = vpop.f32.mrf.mxu1 }
 0x347   : > { %586 = vst.msk [vmem:[#allocation4 + $0x18] sm:$0xff] %vm237_vm1, %v566_v43  ;;  %v564_v46 = vmax.f32 %v488_v44, 0.0  ;;  %v509_v47 = vadd.f32 %v1167_v45, %v1666_v33 }
 0x348   : > { %v500_v48 = vpop.f32.mrf.mxu1 }
 0x349   : > { %584 = vst.msk [vmem:[#allocation4 + $0x8] sm:$0xff] %vm237_vm1, %v564_v46  ;;  %v569_v49 = vmax.f32 %v509_v47, 0.0  ;;  %v501_v50 = vadd.f32 %v1666_v33, %v500_v48 }
 0x34a   : > { %v1168_v51 = vpop.f32.mrf.mxu1 }
 0x34b   : > { %589 = vst.msk [vmem:[#allocation4 + $0x30] sm:$0xff] %vm237_vm1, %v569_v49  ;;  %v567_v52 = vmax.f32 %v501_v50, 0.0  ;;  %v512_v53 = vadd.f32 %v1168_v51, %v1666_v33 }
 0x34c   : > { %v503_v54 = vpop.f32.mrf.mxu1 }
 0x34d   : > { %587 = vst.msk [vmem:[#allocation4 + $0x20] sm:$0xff] %vm237_vm1, %v567_v52  ;;  %v570_v55 = vmax.f32 %v512_v53, 0.0  ;;  %v504_v56 = vadd.f32 %v1666_v33, %v503_v54 }
 0x34e   : > { %v1171_v57 = vpop.f32.mrf.mxu1 }
 0x34f   : > { %590 = vst.msk [vmem:[#allocation4 + $0x38] sm:$0xff] %vm237_vm1, %v570_v55  ;;  %v568_v58 = vmax.f32 %v504_v56, 0.0  ;;  %v525_v59 = vadd.f32 %v1171_v57, %v1666_v33 }
 0x350   : > { %v516_v60 = vpop.f32.mrf.mxu1 }
 0x351   : > { %588 = vst.msk [vmem:[#allocation4 + $0x28] sm:$0xff] %vm237_vm1, %v568_v58  ;;  %v573_v61 = vmax.f32 %v525_v59, 0.0  ;;  %v517_v62 = vadd.f32 %v1666_v33, %v516_v60 }
 0x352   : > { %v1172_v63 = vpop.f32.mrf.mxu1 }
 0x353   : > { %593 = vst.msk [vmem:[#allocation4 + $0x50] sm:$0xff] %vm237_vm1, %v573_v61  ;;  %v571_v0 = vmax.f32 %v517_v62, 0.0  ;;  %v528_v1 = vadd.f32 %v1172_v63, %v1666_v33 }
 0x354   : > { %v519_v2 = vpop.f32.mrf.mxu1 }
 0x355   : > { %591 = vst.msk [vmem:[#allocation4 + $0x40] sm:$0xff] %vm237_vm1, %v571_v0  ;;  %v574_v3 = vmax.f32 %v528_v1, 0.0  ;;  %v520_v4 = vadd.f32 %v1666_v33, %v519_v2 }
 0x356   : > { %v1175_v5 = vpop.f32.mrf.mxu1 }
 0x357   : > { %594 = vst.msk [vmem:[#allocation4 + $0x58] sm:$0xff] %vm237_vm1, %v574_v3  ;;  %v572_v6 = vmax.f32 %v520_v4, 0.0  ;;  %v541_v7 = vadd.f32 %v1175_v5, %v1666_v33 }
 0x358   : > { %v532_v8 = vpop.f32.mrf.mxu1 }
 0x359   : > { %592 = vst.msk [vmem:[#allocation4 + $0x48] sm:$0xff] %vm237_vm1, %v572_v6  ;;  %v577_v9 = vmax.f32 %v541_v7, 0.0  ;;  %v533_v11 = vadd.f32 %v1666_v33, %v532_v8 }
 0x35a   : > { %v1176_v13 = vpop.f32.mrf.mxu1 }
 0x35b   : > { %597 = vst.msk [vmem:[#allocation4 + $0x70] sm:$0xff] %vm237_vm1, %v577_v9  ;;  %v575_v15 = vmax.f32 %v533_v11, 0.0  ;;  %v544_v17 = vadd.f32 %v1176_v13, %v1666_v33 }
 0x35c   : > { %v535_v18 = vpop.f32.mrf.mxu1 }
 0x35d   : > { %595 = vst.msk [vmem:[#allocation4 + $0x60] sm:$0xff] %vm237_vm1, %v575_v15  ;;  %v578_v19 = vmax.f32 %v544_v17, 0.0  ;;  %v536_v20 = vadd.f32 %v1666_v33, %v535_v18 }
 0x35e   : > { %v1179_v21 = vpop.f32.mrf.mxu1 }
 0x35f   : > { %598 = vst.msk [vmem:[#allocation4 + $0x78] sm:$0xff] %vm237_vm1, %v578_v19  ;;  %v576_v22 = vmax.f32 %v536_v20, 0.0  ;;  %v557_v23 = vadd.f32 %v1179_v21, %v1666_v33 }
 0x360   : > { %v548_v24 = vpop.f32.mrf.mxu1 }
 0x361   : > { %596 = vst.msk [vmem:[#allocation4 + $0x68] sm:$0xff] %vm237_vm1, %v576_v22  ;;  %v581_v25 = vmax.f32 %v557_v23, 0.0  ;;  %v549_v26 = vadd.f32 %v1666_v33, %v548_v24 }
 0x362   : > { %v1180_v27 = vpop.f32.mrf.mxu1 }
 0x363   : > { %601 = vst.msk [vmem:[#allocation4 + $0x90] sm:$0xff] %vm237_vm1, %v581_v25  ;;  %v579_v28 = vmax.f32 %v549_v26, 0.0  ;;  %v560_v29 = vadd.f32 %v1180_v27, %v1666_v33 }
 0x364   : > { %v551_v30 = vpop.f32.mrf.mxu1 }
 0x365   : > { %599 = vst.msk [vmem:[#allocation4 + $0x80] sm:$0xff] %vm237_vm1, %v579_v28  ;;  %v582_v31 = vmax.f32 %v560_v29, 0.0  ;;  %v552_v32 = vadd.f32 %v1666_v33, %v551_v30 }
 0x367   : > { %602 = vst.msk [vmem:[#allocation4 + $0x98] sm:$0xff] %vm237_vm1, %v582_v31  ;;  %v580_v34 = vmax.f32 %v552_v32, 0.0 }
 0x369   : > { %600 = vst.msk [vmem:[#allocation4 + $0x88] sm:$0xff] %vm237_vm1, %v580_v34 }
 0x36a LB: >> { %s613_s18 = sld [smem:[#allocation10 + %s1442_s3]]  ;;  %s616_s26 = scalar_lea.vmem [#allocation4], %s1442_s3  ;;  %vm619_vm4 = vcmask 516096   ;;  %s1442_s3 = sphi %s1440_s3, %s612_s3  }
 0x36b   : >> { %s612_s3 = sadd.s32 1, %s1442_s3  }
 0x36c   : >> { %p609_p7 = scmp.ge.s32.totalorder %s612_s3, 160  }
 0x36d   : > { %s1093_s28 = sshll.u32 (%p609_p7), %s1434_s1, 6  ;;  %s1454_s20 = smov (%p609_p7), 64  }
 0x36e   : > { %s649_s30 = scalar_lea.vmem (%p609_p7), %s1800_s13, %s1093_s28  ;;  %s778_s22 = scalar_lea.vmem (%p609_p7), %s1802_s15, %s1092_s7 }
 0x36f   : > { %v1319_v42 = vld [vmem:[%s649_s30 + $0x38] sm:$0xff] (%p609_p7)   ;;  %v1320_v44 = vld [vmem:[%s649_s30 + $0x30] sm:$0xff] (%p609_p7)   ;;  %v1321_v45 = vld [vmem:[%s649_s30 + $0x28] sm:$0xff] (%p609_p7)   ;;  %s666_s24 = scalar_lea.vmem (%p609_p7), %s1801_s14, %s1434_s1  ;;  %s783_s25 = scalar_lea.vmem (%p609_p7), %s1803_s16, %s1434_s1 }
 0x370   : >> { %v617_v35 = vld [vmem:[%s616_s26] sm:$0x1]  ;;  %s614_s27 = scalar_lea.vmem [#allocation5], %s613_s18  ;;  %611 = sbr.rel (!%p609_p7) target bundleno = 874 (0x36a), region = 167  ;;  %1181 = vmatprep.subr.bf16.mxu0 (%p609_p7), %v1319_v42  ;;  %v1323_v47 = vld [vmem:[%s649_s30 + $0x18] sm:$0xff] (%p609_p7)   ;;  %v1324_v48 = vld [vmem:[%s649_s30 + $0x10] sm:$0xff] (%p609_p7)  }
 0x371   : >> { %v615_v36 = vld [vmem:[%s614_s27] sm:$0x1]  ;;  %1182 = vmatpush3.bf16.msra.mxu0 (%p609_p7), %v1319_v42  ;;  %v1325_v49 = vld [vmem:[%s649_s30 + $0x8] sm:$0xff] (%p609_p7)   ;;  %s195_s1 = sadd.s32 (%p609_p7), 1, %s1434_s1  }
 0x372   : >> { %v618_v37 = vadd.f32 %v617_v35, %v615_v36  ;;  %1183 = vmatprep.subr.bf16.mxu0 (%p609_p7), %v1320_v44  ;;  %v1322_v46 = vld [vmem:[%s649_s30 + $0x20] sm:$0xff] (%p609_p7)   ;;  %v1327_v63 = vld [vmem:[%s778_s22 + $0x8] sm:$0xff] (%p609_p7)   ;;  %p192_p8 = scmp.ge.s32.totalorder (%p609_p7), %s195_s1, 3  }
 0x373   : > { %v1326_v50 = vld [vmem:[%s649_s30] sm:$0xff] (%p609_p7)   ;;  %1201 = vmatprep.subr.bf16.mxu1 (%p609_p7), %v1327_v63 }
 0x374   : >> { %620 = vst.msk [vmem:[%s614_s27] sm:$0x1] %vm619_vm4, %v618_v37  ;;  %1202 = vmatpush3.bf16.msra.mxu1 (%p609_p7), %v1327_v63  ;;  %v1328_v0 = vld [vmem:[%s778_s22] sm:$0xff] (%p609_p7)  }
 0x375   : > { %1184 = vmatpush3.bf16.msra.mxu0 %v1320_v44  ;;  %1203 = vmatprep.subr.bf16.mxu1 %v1328_v0  ;;  %v1074_v3 = vld [vmem:[%s666_s24] ss:$0 sm:$0xff]  ;;  %vm871_vm5 = vcmask (%p192_p8), 517120   ;;  %s1444_s3 = smov (%p192_p8), 0  }
 0x376   : > { %1185 = vmatprep.subr.bf16.mxu0 %v1321_v45  ;;  %v1084_v20 = vld [vmem:[%s783_s25] ss:$0 sm:$0xff] }
 0x378   : > { %1204 = vmatpush3.bf16.msra.mxu1 %v1328_v0 }
 0x379   : > { %1186 = vmatpush3.bf16.msra.mxu0 %v1321_v45 }
 0x37a   : > { %1187 = vmatprep.subr.bf16.mxu0 %v1322_v46 }
 0x37b   : > { %v621_v33 = vld [vmem:[#allocation5] sm:$0xff]  ;;  %v622_v38 = vld [vmem:[#allocation5 + $0x8] sm:$0xff]  ;;  %v623_v39 = vld [vmem:[#allocation5 + $0x10] sm:$0xff] }
 0x37c   : > { %v1309_v40 = vpack.i.bf16 %v622_v38, %v621_v33  ;;  %v624_v41 = vld [vmem:[#allocation5 + $0x18] sm:$0xff] }
 0x37d   : > { %v1314_v43 = vpack.i.bf16 %v624_v41, %v623_v39  ;;  %1188 = vmatpush3.bf16.msra.mxu0 %v1322_v46 }
 0x37e   : > { %1310 = vrot.lane.b32.xlu0 %v1309_v40, %s1454_s20  ;;  %1189 = vmatprep.subr.bf16.mxu0 %v1323_v47 }
 0x381   : > { %1190 = vmatpush3.bf16.msra.mxu0 %v1323_v47 }
 0x382   : > { %1315 = vrot.lane.b32.xlu0 %v1314_v43, %s1454_s20  ;;  %1191 = vmatprep.subr.bf16.mxu0 %v1324_v48 }
 0x385   : > { %1192 = vmatpush3.bf16.msra.mxu0 %v1324_v48 }
 0x386   : > { %1193 = vmatprep.subr.bf16.mxu0 %v1325_v49 }
 0x389   : > { %1194 = vmatpush3.bf16.msra.mxu0 %v1325_v49 }
 0x38a   : > { %1195 = vmatprep.subr.bf16.mxu0 %v1326_v50 }
 0x38d   : > { %1196 = vmatpush3.bf16.msra.mxu0 %v1326_v50 }
 0x3f0   : > { %v1311_v51 = vpop.permute.xlu0 %1310 }
 0x3f1   : > { %v1313_v52 = vunpack.i.h.bf16 %v1311_v51  ;;  %v1312_v53 = vunpack.i.l.bf16 %v1311_v51 }
 0x3f3   : > { %v642_v54 = vsel %vm237_vm1, %v1426_v16, %v1313_v52  ;;  %v641_v55 = vsel %vm237_vm1, %v1430_v12, %v1312_v53 }
 0x3f4   : > { %v1316_v56 = vpop.permute.xlu0 %1315  ;;  %v645_v57 = vpack.c.bf16 %v642_v54, %v641_v55 }
 0x3f5   : > { %v1318_v58 = vunpack.i.h.bf16 %v1316_v56  ;;  %v1317_v59 = vunpack.i.l.bf16 %v1316_v56 }
 0x3f6   : > { %1197 = vmatprep.mubr.bf16.mxu0 %v645_v57 }
 0x3f7   : > { %v644_v60 = vsel %vm237_vm1, %v1418_v14, %v1318_v58  ;;  %v643_v61 = vsel %vm237_vm1, %v1422_v10, %v1317_v59 }
 0x3f8   : > { %v646_v62 = vpack.c.bf16 %v644_v60, %v643_v61 }
 0x3fa   : > { %1198 = vmatmul.mubr.bf16.vlgmr.msra.gmra.mxu0 %v646_v62 }
 0x4ba   : > { %v1199_v1 = vpop.f32.mrf.mxu0 }
 0x4bb   : > { %v765_v7 = vadd.f32 %v1199_v1, %v1074_v3 }
 0x4bc   : > { %v756_v2 = vpop.f32.mrf.mxu0 }
 0x4bd   : > { %v757_v5 = vadd.f32 %v1074_v3, %v756_v2  ;;  %v773_v17 = vmax.f32 %v765_v7, 0.0 }
 0x4be   : > { %v1200_v4 = vpop.f32.mrf.mxu0 }
 0x4bf   : > { %v768_v6 = vadd.f32 %v1200_v4, %v1074_v3  ;;  %v771_v13 = vmax.f32 %v757_v5, 0.0 }
 0x4c0   : > { %v759_v8 = vpop.f32.mrf.mxu0 }
 0x4c1   : > { %v760_v9 = vadd.f32 %v1074_v3, %v759_v8  ;;  %v774_v11 = vmax.f32 %v768_v6, 0.0 }
 0x4c3   : > { %v772_v15 = vmax.f32 %v760_v9, 0.0  ;;  %v776_v19 = vpack.c.bf16 %v774_v11, %v773_v17 }
 0x4c5   : > { %v775_v18 = vpack.c.bf16 %v772_v15, %v771_v13 }
 0x4c7   : > { %1205 = vmatprep.mubr.msk.bf16.mxu1 %vm293_vm2, %v775_v18 }
 0x4c8   : > { %1206 = vmatmul.mubr.msk.bf16.vlgmr.msra.gmra.mxu1 %vm293_vm2, %v776_v19 }
 0x588   : > { %v1207_v21 = vpop.f32.mrf.mxu1 }
 0x589   : > { %v852_v22 = vadd.f32 %v1207_v21, %v1084_v20 }
 0x58a   : > { %v843_v23 = vpop.f32.mrf.mxu1 }
 0x58b   : > { %v860_v24 = vmax.f32 %v852_v22, 0.0  ;;  %v844_v25 = vadd.f32 %v1084_v20, %v843_v23 }
 0x58c   : > { %v1208_v26 = vpop.f32.mrf.mxu1 }
 0x58d   : > { %v864_v27 = vadd.f32 %v1422_v10, %v860_v24   ;;  %v858_v28 = vmax.f32 %v844_v25, 0.0  ;;  %v855_v29 = vadd.f32 %v1208_v26, %v1084_v20 }
 0x58e   : > { %v846_v30 = vpop.f32.mrf.mxu1 }
 0x58f   : > { %v862_v31 = vadd.f32 %v1430_v12, %v858_v28   ;;  %v861_v32 = vmax.f32 %v855_v29, 0.0  ;;  %v847_v34 = vadd.f32 %v1084_v20, %v846_v30  ;;  %v1817_v10 = vmov %v864_v27  ;;  %869 = vst.msk [vmem:[#allocation5 + $0x10] sm:$0xff] (%p192_p8), %vm237_vm1, %v864_v27 }
 0x591   : > { %v865_v35 = vadd.f32 %v1418_v14, %v861_v32   ;;  %v859_v36 = vmax.f32 %v847_v34, 0.0  ;;  %v1819_v12 = vmov %v862_v31  ;;  %194 = sbr.rel (!%p192_p8) target bundleno = 276 (0x114), region = 178  ;;  %867 = vst.msk [vmem:[#allocation5] sm:$0xff] (%p192_p8), %vm237_vm1, %v862_v31 }
 0x592   :  { %v1455_v12 = vmov (%p192_p8), 0.0  }
 0x593   : > { %v863_v37 = vadd.f32 %v1426_v16, %v859_v36   ;;  %v1816_v14 = vmov %v865_v35  ;;  %870 = vst.msk [vmem:[#allocation5 + $0x18] sm:$0xff] (%p192_p8), %vm237_vm1, %v865_v35 }
 0x594   :  { %872 = vst.msk [vmem:[#allocation6] sm:$0x3] (%p192_p8), %vm871_vm5, %v1455_v12 }
 0x595   : > { %v1818_v16 = vmov %v863_v37  ;;  %868 = vst.msk [vmem:[#allocation5 + $0x8] sm:$0xff] (%p192_p8), %vm237_vm1, %v863_v37 }
 0x596 LB: > { %s879_s18 = sld [smem:[#allocation12 + %s1446_s3]]  ;;  %s882_s26 = scalar_lea.vmem [#allocation5], %s1446_s3  ;;  %s1446_s3 = sphi %s1444_s3, %s878_s3  }
 0x597   : > { %s878_s3 = sadd.s32 1, %s1446_s3  }
 0x598   : > { %p875_p9 = scmp.ge.s32.totalorder %s878_s3, 32  }
 0x599   :  { %v888_v14 = vld [vmem:[%s1792_s5] sm:$0x3] (%p875_p9)  ;;  %1209 = vmatprep.subr.mxu0 (%p875_p9), %v1455_v12  ;;  %v902_v16 = vld [vmem:[%s1804_s17 + $0x38] sm:$0xff] (%p875_p9)  ;;  %v901_v39 = vld [vmem:[%s1804_s17 + $0x30] sm:$0xff] (%p875_p9)  ;;  %v1456_v40 = vmov (%p875_p9), 0   ;;  %vm1457_vm6 = vmmov (%p875_p9), 0  }
 0x59a   :  { %1329 = vset.pattern.permute.xlu0 (%p875_p9), %v1456_v40  ;;  %1210 = vmatpush3.msra.mxu0 (%p875_p9), %v902_v16  ;;  %v900_v41 = vld [vmem:[%s1804_s17 + $0x28] sm:$0xff] (%p875_p9)  ;;  %v899_v42 = vld [vmem:[%s1804_s17 + $0x20] sm:$0xff] (%p875_p9)  ;;  %v898_v43 = vld [vmem:[%s1804_s17 + $0x18] sm:$0xff] (%p875_p9)  ;;  %vm984_vm7 = vcmask (%p875_p9), 1024  }
 0x59b   :  { %891 = vperm.xlu0 (%p875_p9), %1329, %v888_v14   ;;  %1211 = vmatprep.subr.mxu0 (%p875_p9), %v1455_v12  ;;  %v897_v44 = vld [vmem:[%s1804_s17 + $0x10] sm:$0xff] (%p875_p9)  ;;  %v896_v45 = vld [vmem:[%s1804_s17 + $0x8] sm:$0xff] (%p875_p9)  ;;  %v895_v46 = vld [vmem:[%s1804_s17] sm:$0xff] (%p875_p9) }
 0x59c   : > { %v883_v33 = vld [vmem:[%s882_s26] sm:$0x1]  ;;  %s880_s1 = scalar_lea.vmem [#allocation6], %s879_s18  ;;  %877 = sbr.rel (!%p875_p9) target bundleno = 1430 (0x596), region = 189  ;;  %1212 = vmatpush3.msra.mxu0 (%p875_p9), %v901_v39  ;;  %1225 = vmatprep.mubr.msk.f32.mxu0 (%p875_p9), %vm1457_vm6, %v1455_v12  ;;  %v1089_v50 = vld [vmem:[#allocation7] ss:$0 sm:$0xff] (%p875_p9) }
 0x59d   : > { %v881_v38 = vld [vmem:[%s880_s1] sm:$0x1]  ;;  %1213 = vmatprep.subr.mxu0 (%p875_p9), %v1455_v12 }
 0x59e   : > { %v884_v10 = vadd.f32 %v883_v33, %v881_v38  ;;  %1214 = vmatpush3.msra.mxu0 (%p875_p9), %v900_v41 }
 0x59f   :  { %1215 = vmatprep.subr.mxu0 (%p875_p9), %v1455_v12 }
 0x5a0   : > { %886 = vst.msk [vmem:[%s880_s1] sm:$0x1] %vm619_vm4, %v884_v10  ;;  %1216 = vmatpush3.msra.mxu0 (%p875_p9), %v899_v42 }
 0x5a1   :  { %1217 = vmatprep.subr.mxu0 %v1455_v12 }
 0x5a2   :  { %1218 = vmatpush3.msra.mxu0 %v898_v43 }
 0x5a3   :  { %1219 = vmatprep.subr.mxu0 %v1455_v12 }
 0x5a4   :  { %1220 = vmatpush3.msra.mxu0 %v897_v44 }
 0x5a5   :  { %1221 = vmatprep.subr.mxu0 %v1455_v12 }
 0x5a6   :  { %1222 = vmatpush3.msra.mxu0 %v896_v45 }
 0x5a7   :  { %1223 = vmatprep.subr.mxu0 %v1455_v12  ;;  %v887_v47 = vld [vmem:[#allocation6] sm:$0x3] }
 0x5a8   :  { %1224 = vmatpush3.msra.mxu0 %v895_v46 }
 0x616   :  { %v892_v48 = vpop.permute.xlu0 %891 }
 0x617   :  { %v894_v49 = vmul.f32 %v892_v48, %v887_v47 }
 0x619   :  { %1226 = vmatmul.mubr.msk.f32.vlgmr.msra.gmra.mxu0 %vm237_vm1, %v894_v49 }
 0x6d9   :  { %v979_v51 = vpop.f32.mrf.mxu0 }
 0x6da   :  { %v980_v52 = vadd.f32 %v1089_v50, %v979_v51 }
 0x6db   :  { %v1227_v53 = vpop.f32.mrf.mxu0 }
 0x6dc   :  { %v983_v54 = vmax.f32 %v980_v52, 0.0 }
 0x6de   :  { %985 = vst.msk [vmem:[%s1806_s19] sm:$0x3] %vm984_vm7, %v983_v54 }
 0x6df   :  { %990 = vsyncpa [#allocation9], 1 }
 0x6e0   :  { %991 = vsyncpa [#allocation11], 1 }
 0x6e1   :  { %992 = vsyncpa [#allocation14], 1 }

</bundles_post_ra>
